<compile_context>
chip_gen: v7x
topology: tpu7x:2x2x1
jax: 0.10.0
libtpu: 0.0.40
codegen_flags: <defaults>
</compile_context>

<pallas_src>
import jax
import jax.numpy as jnp
from jax import lax
from jax.experimental import pallas as pl
from jax.experimental.pallas import tpu as pltpu


# ----------------------------- kernels ---------------------------------------

def _ln_kernel_withbias(x_ref, w_ref, b_ref, o_ref):
    # x_ref: (C, TN) f32 -- channels on sublanes, pixels on lanes.
    x = x_ref[...]
    mu = jnp.mean(x, axis=0, keepdims=True)                  # (1, TN)
    xc = x - mu
    var = jnp.mean(xc * xc, axis=0, keepdims=True)           # unbiased=False variance
    inv = lax.rsqrt(var + 1e-5)                              # EUP rsqrt (no VALU divide)
    o_ref[...] = xc * inv * w_ref[...] + b_ref[...]


def _ln_kernel_biasfree(x_ref, w_ref, o_ref):
    # BiasFree_LayerNorm: variance is computed around the mean, but the mean is NOT
    # subtracted from x in the output (matches torch: x / sqrt(var+eps) * weight).
    x = x_ref[...]
    mu = jnp.mean(x, axis=0, keepdims=True)
    xc = x - mu
    var = jnp.mean(xc * xc, axis=0, keepdims=True)
    inv = lax.rsqrt(var + 1e-5)
    o_ref[...] = x * inv * w_ref[...]


# ----------------------------- wrapper ----------------------------------------

def make_layernorm(dim, ln_type="WithBias", tile_n=2048):
    """Returns a jitted forward(x_nchw, weight[, bias]) matching the PyTorch module."""
    assert tile_n % 128 == 0
    C = dim
    with_bias = (ln_type != "BiasFree")

    def forward(x, weight, bias=None):
        B, Cx, H, W = x.shape
        assert Cx == C
        N = B * H * W

        # NCHW -> (C, B*H*W): channels on sublanes, all pixels of the whole batch
        # packed lane-dense.  Per-pixel LayerNorm is independent along lanes, so any
        # lane tiling is valid.
        xf = x.astype(jnp.float32).transpose(1, 0, 2, 3).reshape(C, N)

        # Lane tile: biggest of (tile_n, padded-N), always a multiple of 128.
        TN = min(tile_n, pl.cdiv(N, 128) * 128)
        Np = pl.cdiv(N, TN) * TN
        if Np != N:
            # Zero-padded tail columns are normalized independently (var=0 -> finite
            # rsqrt(1e-5)) and sliced off below, so they never affect real outputs.
            xf = jnp.pad(xf, ((0, 0), (0, Np - N)))

        w2 = weight.astype(jnp.float32).reshape(C, 1)
        args = [xf, w2]
        in_specs = [
            pl.BlockSpec((C, TN), lambda i: (0, i)),
            pl.BlockSpec((C, 1), lambda i: (0, 0)),
        ]
        if with_bias:
            args.append(bias.astype(jnp.float32).reshape(C, 1))
            in_specs.append(pl.BlockSpec((C, 1), lambda i: (0, 0)))
            kern = _ln_kernel_withbias
        else:
            kern = _ln_kernel_biasfree

        out = pl.pallas_call(
            kern,
            grid=(Np // TN,),
            in_specs=in_specs,
            out_specs=pl.BlockSpec((C, TN), lambda i: (0, i)),
            out_shape=jax.ShapeDtypeStruct((C, Np), jnp.float32),
            compiler_params=pltpu.CompilerParams(
                dimension_semantics=("parallel",)),       # megacore sharding on v7x
        )(*args)

        out = out[:, :N].reshape(C, B, H, W).transpose(1, 0, 2, 3)
        return out

    return jax.jit(forward)


# ----------------------------- reference --------------------------------------

def reference(x, weight, bias, ln_type):
    # Pure-JAX (XLA) reference with the exact PyTorch semantics:
    # to_3d -> LayerNorm over channels -> to_4d.
    B, C, H, W = x.shape
    x3 = x.astype(jnp.float32).transpose(0, 2, 3, 1).reshape(B, H * W, C)
    mu = jnp.mean(x3, axis=-1, keepdims=True)
    var = jnp.mean((x3 - mu) ** 2, axis=-1, keepdims=True)
    if ln_type == "BiasFree":
        y = x3 / jnp.sqrt(var + 1e-5) * weight.reshape(1, 1, C)
    else:
        y = (x3 - mu) / jnp.sqrt(var + 1e-5) * weight.reshape(1, 1, C) + bias.reshape(1, 1, C)
    return y.reshape(B, H, W, C).transpose(0, 3, 1, 2)


# ----------------------------- test -------------------------------------------

if __name__ == "__main__":
    key = jax.random.PRNGKey(0)
    k1, k2, k3, k4, k5 = jax.random.split(key, 5)

    def check(o, r):
        err = float(jnp.max(jnp.abs(o - r)))
        scale = float(jnp.max(jnp.abs(r)))
        return (o.shape == r.shape
                and bool(jnp.all(jnp.isfinite(o)))
                and err <= 2e-3 * max(scale, 1.0))

    # 1) WithBias LayerNorm, dim=16 (ssdnet TransformerBlock config), x: (2,16,16,16)
    B, C, H, W = 2, 16, 16, 16
    x = jax.random.normal(k1, (B, C, H, W), jnp.float32)
    w = 1.0 + 0.1 * jax.random.normal(k2, (C,), jnp.float32)
    b = 0.1 * jax.random.normal(k3, (C,), jnp.float32)
    fwd_wb = make_layernorm(C, "WithBias")
    out_wb = jax.block_until_ready(fwd_wb(x, w, b))
    ok_wb = check(out_wb, reference(x, w, b, "WithBias"))

    # 2) BiasFree LayerNorm, dim=4, non-multiple-of-128 pixel count (exercises padding)
    B2, C2, H2, W2 = 2, 4, 20, 24
    x2 = jax.random.normal(k4, (B2, C2, H2, W2), jnp.float32)
    w2 = 1.0 + 0.1 * jax.random.normal(k5, (C2,), jnp.float32)
    fwd_bf = make_layernorm(C2, "BiasFree")
    out_bf = jax.block_until_ready(fwd_bf(x2, w2))
    ok_bf = check(out_bf, reference(x2, w2, None, "BiasFree"))

    if not (ok_wb and ok_bf):
        raise SystemExit("MISMATCH")
    print("KERNEL_OK")
</pallas_src>

<mosaic_0001>
module attributes {stable_mosaic.version = 11 : i64} {
  func.func @_ln_kernel_withbias(%arg0: i32, %arg1: memref<16x512xf32, #tpu.memory_space<vmem>>, %arg2: memref<16x1xf32, #tpu.memory_space<vmem>>, %arg3: memref<16x1xf32, #tpu.memory_space<vmem>>, %arg4: memref<16x512xf32, #tpu.memory_space<vmem>>) attributes {dimension_semantics = [#tpu.dimension_semantics<parallel>], iteration_bounds = array<i64: 1>, scalar_prefetch = 0 : i64, scratch_operands = 0 : i64, tpu.core_type = #tpu.core_type<tc>, window_params = [{transform_indices = @transform_0, window_bounds = array<i64: 16, 512>}, {pipeline_mode = #tpu.pipeline_mode<synchronous>, transform_indices = @transform_1, window_bounds = array<i64: 16, 1>}, {pipeline_mode = #tpu.pipeline_mode<synchronous>, transform_indices = @transform_2, window_bounds = array<i64: 16, 1>}, {transform_indices = @transform_3, window_bounds = array<i64: 16, 512>}]} {
    %c0 = arith.constant 0 : index
    %c0_0 = arith.constant 0 : index
    %0 = vector.load %arg1[%c0, %c0_0] : memref<16x512xf32, #tpu.memory_space<vmem>>, vector<16x512xf32>
    %cst = arith.constant dense<0.000000e+00> : vector<512xf32>
    %1 = vector.multi_reduction <add>, %0, %cst [0] : vector<16x512xf32> to vector<512xf32>
    %2 = vector.shape_cast %1 : vector<512xf32> to vector<1x512xf32>
    %cst_1 = arith.constant 1.600000e+01 : f32
    %3 = vector.broadcast %cst_1 : f32 to vector<1x512xf32>
    %4 = arith.divf %2, %3 : vector<1x512xf32>
    %5 = vector.broadcast %4 : vector<1x512xf32> to vector<16x512xf32>
    %6 = arith.subf %0, %5 : vector<16x512xf32>
    %7 = arith.mulf %6, %6 : vector<16x512xf32>
    %cst_2 = arith.constant dense<0.000000e+00> : vector<512xf32>
    %8 = vector.multi_reduction <add>, %7, %cst_2 [0] : vector<16x512xf32> to vector<512xf32>
    %9 = vector.shape_cast %8 : vector<512xf32> to vector<1x512xf32>
    %cst_3 = arith.constant 1.600000e+01 : f32
    %10 = vector.broadcast %cst_3 : f32 to vector<1x512xf32>
    %11 = arith.divf %9, %10 : vector<1x512xf32>
    %cst_4 = arith.constant 9.99999974E-6 : f32
    %12 = vector.broadcast %cst_4 : f32 to vector<1x512xf32>
    %13 = arith.addf %11, %12 : vector<1x512xf32>
    %14 = math.rsqrt %13 : vector<1x512xf32>
    %15 = vector.broadcast %14 : vector<1x512xf32> to vector<16x512xf32>
    %16 = arith.mulf %6, %15 : vector<16x512xf32>
    %c0_5 = arith.constant 0 : index
    %c0_6 = arith.constant 0 : index
    %17 = vector.load %arg2[%c0_5, %c0_6] : memref<16x1xf32, #tpu.memory_space<vmem>>, vector<16x1xf32>
    %18 = vector.broadcast %17 : vector<16x1xf32> to vector<16x512xf32>
    %19 = arith.mulf %16, %18 : vector<16x512xf32>
    %c0_7 = arith.constant 0 : index
    %c0_8 = arith.constant 0 : index
    %20 = vector.load %arg3[%c0_7, %c0_8] : memref<16x1xf32, #tpu.memory_space<vmem>>, vector<16x1xf32>
    %21 = vector.broadcast %20 : vector<16x1xf32> to vector<16x512xf32>
    %22 = arith.addf %19, %21 : vector<16x512xf32>
    %c0_9 = arith.constant 0 : index
    %c0_10 = arith.constant 0 : index
    %23 = vector.load %arg4[%c0_9, %c0_10] : memref<16x512xf32, #tpu.memory_space<vmem>>, vector<16x512xf32>
    tpu.vector_store %arg4[%c0_9, %c0_10], %22 {strides = array<i32>} : memref<16x512xf32, #tpu.memory_space<vmem>>, vector<16x512xf32>,
    return
  }
  func.func @transform_0(%arg0: i32) -> (i32, i32) {
    %c0_i32 = arith.constant 0 : i32
    %c0_i32_0 = arith.constant 0 : i32
    return %c0_i32, %arg0 : i32, i32
  }
  func.func @transform_1(%arg0: i32) -> (i32, i32) {
    %c0_i32 = arith.constant 0 : i32
    %c0_i32_0 = arith.constant 0 : i32
    %c0_i32_1 = arith.constant 0 : i32
    return %c0_i32, %c0_i32_0 : i32, i32
  }
  func.func @transform_2(%arg0: i32) -> (i32, i32) {
    %c0_i32 = arith.constant 0 : i32
    %c0_i32_0 = arith.constant 0 : i32
    %c0_i32_1 = arith.constant 0 : i32
    return %c0_i32, %c0_i32_0 : i32, i32
  }
  func.func @transform_3(%arg0: i32) -> (i32, i32) {
    %c0_i32 = arith.constant 0 : i32
    %c0_i32_0 = arith.constant 0 : i32
    return %c0_i32, %arg0 : i32, i32
  }
}

</mosaic_0001>

<bundles_post_ra>
// kernel: forward.1
= control target key start
LH: loop header
LB: loop body
LE: loop exit
PB: predicated region body
PF: predicated region fallthrough
CT: control target
= control target key end

     0   :  { %v182_v0 = vmov 0   ;;  %s278_s2 = inlined_call_operand.vmem [shape: f32[16,1], index: 2, kind: input, shape index: {}]   ;;  %s279_s1 = inlined_call_operand.vmem [shape: f32[16,1], index: 1, kind: input, shape index: {}]   ;;  %s280_s0 = inlined_call_operand.vmem [shape: f32[16,512], index: 0, kind: input, shape index: {}]   ;;  %s281_s3 = inlined_call_operand.vmem [shape: f32[16,512], index: 3, kind: output, shape index: {}]  }
   0x1   :  { %173 = vset.pattern.permute.xlu1 %v182_v0  ;;  %172 = vset.pattern.permute.xlu0 %v182_v0  ;;  %v139_v1 = vld [vmem:[%s278_s2] sm:$0xff]  ;;  %v140_v3 = vld [vmem:[%s278_s2 + $0x8] sm:$0xff]  ;;  %v16_v9 = vld [vmem:[%s280_s0 + $0x10] sm:$0xff] }
   0x2   :  { %v119_v2 = vld [vmem:[%s279_s1] sm:$0xff]  ;;  %143 = vperm.xlu1 %173, %v139_v1   ;;  %v120_v4 = vld [vmem:[%s279_s1 + $0x8] sm:$0xff]  ;;  %v20_v10 = vld [vmem:[%s280_s0 + $0x30] sm:$0xff] }
   0x3   :  { %123 = vperm.xlu0 %172, %v119_v2   ;;  %v14_v5 = vld [vmem:[%s280_s0] sm:$0xff]  ;;  %v15_v7 = vld [vmem:[%s280_s0 + $0x8] sm:$0xff]  ;;  %v17_v11 = vld [vmem:[%s280_s0 + $0x18] sm:$0xff]  ;;  %v36_v15 = vadd.f32 %v20_v10, %v16_v9 }
   0x4   :  { %v18_v6 = vld [vmem:[%s280_s0 + $0x20] sm:$0xff]  ;;  %v19_v8 = vld [vmem:[%s280_s0 + $0x28] sm:$0xff]  ;;  %v21_v12 = vld [vmem:[%s280_s0 + $0x38] sm:$0xff] }
   0x5   :  { %v22_v13 = vadd.f32 %v18_v6, %v14_v5  ;;  %v29_v14 = vadd.f32 %v19_v8, %v15_v7  ;;  %v43_v16 = vadd.f32 %v21_v12, %v17_v11  ;;  %v37_v19 = vrot.slane %v36_v15, 4 }
   0x6   :  { %148 = vperm.xlu1 %173, %v140_v3  }
   0x7   :  { %128 = vperm.xlu0 %172, %v120_v4   ;;  %v23_v17 = vrot.slane %v22_v13, 4  ;;  %v30_v18 = vrot.slane %v29_v14, 4  ;;  %v44_v20 = vrot.slane %v43_v16, 4  ;;  %v38_v23 = vadd.f32 %v37_v19, %v36_v15 }
   0x9   :  { %v24_v21 = vadd.f32 %v23_v17, %v22_v13  ;;  %v31_v22 = vadd.f32 %v30_v18, %v29_v14  ;;  %v45_v24 = vadd.f32 %v44_v20, %v43_v16  ;;  %v39_v27 = vrot.slane %v38_v23, 2 }
   0xb   :  { %v25_v25 = vrot.slane %v24_v21, 2  ;;  %v32_v26 = vrot.slane %v31_v22, 2  ;;  %v46_v28 = vrot.slane %v45_v24, 2  ;;  %v40_v31 = vadd.f32 %v39_v27, %v38_v23 }
   0xd   :  { %v26_v29 = vadd.f32 %v25_v25, %v24_v21  ;;  %v33_v30 = vadd.f32 %v32_v26, %v31_v22  ;;  %v47_v32 = vadd.f32 %v46_v28, %v45_v24  ;;  %v41_v35 = vrot.slane %v40_v31, 1 }
   0xf   :  { %v27_v33 = vrot.slane %v26_v29, 1  ;;  %v34_v34 = vrot.slane %v33_v30, 1  ;;  %v48_v36 = vrot.slane %v47_v32, 1  ;;  %v42_v39 = vadd.f32 %v41_v35, %v40_v31 }
  0x11   :  { %v28_v37 = vadd.f32 %v27_v33, %v26_v29  ;;  %v35_v38 = vadd.f32 %v34_v34, %v33_v30  ;;  %v49_v40 = vadd.f32 %v48_v36, %v47_v32  ;;  %v53_v43 = vmul.f32 0.0625, %v42_v39 }
  0x13   :  { %v51_v41 = vmul.f32 0.0625, %v28_v37  ;;  %v52_v42 = vmul.f32 0.0625, %v35_v38  ;;  %v54_v44 = vmul.f32 0.0625, %v49_v40  ;;  %v57_v49 = vsub.f32 %v16_v9, %v53_v43 }
  0x14   :  { %v243_v50 = vsub.f32 %v20_v10, %v53_v43 }
  0x15   :  { %v55_v45 = vsub.f32 %v14_v5, %v51_v41  ;;  %v239_v46 = vsub.f32 %v18_v6, %v51_v41  ;;  %v56_v47 = vsub.f32 %v15_v7, %v52_v42  ;;  %v241_v48 = vsub.f32 %v19_v8, %v52_v42 }
  0x16   :  { %v58_v51 = vsub.f32 %v17_v11, %v54_v44  ;;  %v62_v52 = vsub.f32 %v21_v12, %v54_v44  ;;  %v65_v57 = vmul.f32 %v57_v49, %v57_v49  ;;  %v69_v58 = vmul.f32 %v243_v50, %v243_v50 }
  0x17   :  { %v63_v53 = vmul.f32 %v55_v45, %v55_v45  ;;  %v67_v54 = vmul.f32 %v239_v46, %v239_v46  ;;  %v64_v55 = vmul.f32 %v56_v47, %v56_v47  ;;  %v68_v56 = vmul.f32 %v241_v48, %v241_v48 }
  0x18   :  { %v66_v59 = vmul.f32 %v58_v51, %v58_v51  ;;  %v70_v60 = vmul.f32 %v62_v52, %v62_v52  ;;  %v85_v63 = vadd.f32 %v69_v58, %v65_v57 }
  0x19   :  { %v71_v61 = vadd.f32 %v67_v54, %v63_v53  ;;  %v78_v62 = vadd.f32 %v68_v56, %v64_v55 }
  0x1a   :  { %v92_v0 = vadd.f32 %v70_v60, %v66_v59  ;;  %v86_v3 = vrot.slane %v85_v63, 4 }
  0x1b   :  { %v72_v1 = vrot.slane %v71_v61, 4  ;;  %v79_v2 = vrot.slane %v78_v62, 4 }
  0x1c   :  { %v93_v4 = vrot.slane %v92_v0, 4  ;;  %v87_v7 = vadd.f32 %v86_v3, %v85_v63 }
  0x1d   :  { %v73_v5 = vadd.f32 %v72_v1, %v71_v61  ;;  %v80_v6 = vadd.f32 %v79_v2, %v78_v62 }
  0x1e   :  { %v94_v8 = vadd.f32 %v93_v4, %v92_v0  ;;  %v88_v11 = vrot.slane %v87_v7, 2 }
  0x1f   :  { %v74_v9 = vrot.slane %v73_v5, 2  ;;  %v81_v10 = vrot.slane %v80_v6, 2 }
  0x20   :  { %v95_v12 = vrot.slane %v94_v8, 2  ;;  %v89_v15 = vadd.f32 %v88_v11, %v87_v7 }
  0x21   :  { %v75_v13 = vadd.f32 %v74_v9, %v73_v5  ;;  %v82_v14 = vadd.f32 %v81_v10, %v80_v6 }
  0x22   :  { %v96_v16 = vadd.f32 %v95_v12, %v94_v8  ;;  %v90_v19 = vrot.slane %v89_v15, 1 }
  0x23   :  { %v76_v17 = vrot.slane %v75_v13, 1  ;;  %v83_v18 = vrot.slane %v82_v14, 1 }
  0x24   :  { %v97_v20 = vrot.slane %v96_v16, 1  ;;  %v91_v23 = vadd.f32 %v90_v19, %v89_v15 }
  0x25   :  { %v77_v21 = vadd.f32 %v76_v17, %v75_v13  ;;  %v84_v22 = vadd.f32 %v83_v18, %v82_v14 }
  0x26   :  { %v98_v24 = vadd.f32 %v97_v20, %v96_v16  ;;  %v101_v27 = vmul.f32 0.0625, %v91_v23 }
  0x27   :  { %v99_v25 = vmul.f32 0.0625, %v77_v21  ;;  %v100_v26 = vmul.f32 0.0625, %v84_v22 }
  0x28   :  { %v102_v28 = vmul.f32 0.0625, %v98_v24  ;;  %v105_v31 = vadd.f32 1e-05, %v101_v27 }
  0x29   :  { %v103_v29 = vadd.f32 1e-05, %v99_v25  ;;  %v104_v30 = vadd.f32 1e-05, %v100_v26 }
  0x2a   :  { %v106_v32 = vadd.f32 1e-05, %v102_v28 }
  0x2b   :  { %174 = vrsqrt.f32 %v103_v29 }
  0x2c   :  { %176 = vrsqrt.f32 %v104_v30 }
  0x2d   :  { %178 = vrsqrt.f32 %v105_v31 }
  0x2e   :  { %180 = vrsqrt.f32 %v106_v32 }
  0x35   :  { %v175_v33 = vpop.eup %174 }
  0x36   :  { %v177_v34 = vpop.eup %176  ;;  %v111_v37 = vmul.f32 %v175_v33, %v55_v45  ;;  %v115_v43 = vmul.f32 %v175_v33, %v239_v46 }
  0x37   :  { %v179_v35 = vpop.eup %178  ;;  %v112_v38 = vmul.f32 %v177_v34, %v56_v47  ;;  %v116_v44 = vmul.f32 %v177_v34, %v241_v48 }
  0x38   :  { %v181_v36 = vpop.eup %180  ;;  %v113_v39 = vmul.f32 %v179_v35, %v57_v49  ;;  %v117_v53 = vmul.f32 %v179_v35, %v243_v50 }
  0x39   :  { %v114_v40 = vmul.f32 %v181_v36, %v58_v51  ;;  %v118_v54 = vmul.f32 %v181_v36, %v62_v52 }
  0x81   :  { %v144_v41 = vpop.permute.xlu1 %143 }
  0x82   :  { %v124_v42 = vpop.permute.xlu0 %123 }
  0x83   :  { %v131_v55 = vmul.f32 %v124_v42, %v111_v37  ;;  %v132_v56 = vmul.f32 %v124_v42, %v112_v38  ;;  %v133_v57 = vmul.f32 %v124_v42, %v113_v39  ;;  %v134_v58 = vmul.f32 %v124_v42, %v114_v40 }
  0x85   :  { %v151_v59 = vadd.f32 %v144_v41, %v131_v55  ;;  %v152_v60 = vadd.f32 %v144_v41, %v132_v56  ;;  %v153_v61 = vadd.f32 %v144_v41, %v133_v57  ;;  %v154_v45 = vadd.f32 %v144_v41, %v134_v58  ;;  %v149_v51 = vpop.permute.xlu1 %148 }
  0x86   :  { %v129_v47 = vpop.permute.xlu0 %128 }
  0x87   :  { %159 = vst [vmem:[%s281_s3] sm:$0xff] %v151_v59  ;;  %160 = vst [vmem:[%s281_s3 + $0x8] sm:$0xff] %v152_v60  ;;  %v135_v46 = vmul.f32 %v129_v47, %v115_v43  ;;  %v136_v48 = vmul.f32 %v129_v47, %v116_v44  ;;  %v137_v49 = vmul.f32 %v129_v47, %v117_v53 }
  0x88   :  { %161 = vst [vmem:[%s281_s3 + $0x10] sm:$0xff] %v153_v61  ;;  %162 = vst [vmem:[%s281_s3 + $0x18] sm:$0xff] %v154_v45  ;;  %v138_v50 = vmul.f32 %v129_v47, %v118_v54 }
  0x89   :  { %v155_v52 = vadd.f32 %v149_v51, %v135_v46  ;;  %v156_v62 = vadd.f32 %v149_v51, %v136_v48  ;;  %v157_v63 = vadd.f32 %v149_v51, %v137_v49 }
  0x8a   :  { %v158_v0 = vadd.f32 %v149_v51, %v138_v50 }
  0x8b   :  { %163 = vst [vmem:[%s281_s3 + $0x20] sm:$0xff] %v155_v52  ;;  %164 = vst [vmem:[%s281_s3 + $0x28] sm:$0xff] %v156_v62 }
  0x8c   :  { %165 = vst [vmem:[%s281_s3 + $0x30] sm:$0xff] %v157_v63  ;;  %166 = vst [vmem:[%s281_s3 + $0x38] sm:$0xff] %v158_v0 }

</bundles_post_ra>
